<compile_context>
chip_gen: v7x
topology: tpu7x:2x2x1
jax: 0.10.0
libtpu: 0.0.40
codegen_flags: <defaults>
</compile_context>

<pallas_src>
import math

import jax
import jax.numpy as jnp
from jax.experimental import pallas as pl
from jax.experimental.pallas import tpu as pltpu


def dqn_kernel(x_ref, w1_ref, b1_ref, w2_ref, b2_ref, w3_ref, b3_ref, o_ref):
    """One batch tile of the 3-layer MLP: (TB, D) -> (TB, out_pad)."""
    x = x_ref[...]  # f32 activations, no redundant cast

    # Weights arrive in VMEM as bf16 (DMA saving already banked); upcast only
    # as matmul operands, keep epilogue math in f32.
    h1 = jnp.dot(x, w1_ref[...].astype(jnp.float32),
                 preferred_element_type=jnp.float32) + b1_ref[...]
    h1 = jnp.maximum(h1, 0.0)

    h2 = jnp.dot(h1, w2_ref[...].astype(jnp.float32),
                 preferred_element_type=jnp.float32) + b2_ref[...]
    h2 = jnp.maximum(h2, 0.0)

    o_ref[...] = jnp.dot(h2, w3_ref[...].astype(jnp.float32),
                         preferred_element_type=jnp.float32) + b3_ref[...]


def _round_up(x, m):
    return pl.cdiv(x, m) * m


def prepare_dqn_params(params):
    """One-time param prep (do this once per weight update, not per forward):
    cast weights to bf16 and lane-pad the final layer to 128 output columns."""
    w1, b1, w2, b2, w3, b3 = params
    out_dim = w3.shape[1]
    out_pad = _round_up(max(out_dim, 128), 128)
    w3p = jnp.pad(w3, ((0, 0), (0, out_pad - out_dim)))
    b3p = jnp.pad(b3, ((0, 0), (0, out_pad - out_dim)))
    prepped = (w1.astype(jnp.bfloat16), b1.astype(jnp.float32),
               w2.astype(jnp.bfloat16), b2.astype(jnp.float32),
               w3p.astype(jnp.bfloat16), b3p.astype(jnp.float32))
    return prepped, out_dim


def dqn_forward(x_nchw, prepped_params, out_dim, *, tile_b=128):
    """Flatten NCHW input and run the batch-tiled Pallas MLP kernel."""
    w1, b1, w2, b2, w3, b3 = prepped_params
    B = x_nchw.shape[0]
    x = x_nchw.reshape(B, -1).astype(jnp.float32)   # (B, input_dim), like x.view(B, -1)

    input_dim = x.shape[1]
    h1_dim = w1.shape[1]
    h2_dim = w2.shape[1]
    out_pad = w3.shape[1]

    # Batch tile: at least one full 8-row sublane group, at most `tile_b` rows.
    tb = min(tile_b, _round_up(B, 8))
    B_pad = _round_up(B, tb)
    if B_pad != B:
        x = jnp.pad(x, ((0, B_pad - B), (0, 0)))

    grid = (B_pad // tb,)

    out = pl.pallas_call(
        dqn_kernel,
        out_shape=jax.ShapeDtypeStruct((B_pad, out_pad), jnp.float32),
        grid=grid,
        in_specs=[
            pl.BlockSpec((tb, input_dim), lambda i: (i, 0)),        # x: tiled over batch
            pl.BlockSpec((input_dim, h1_dim), lambda i: (0, 0)),    # weights: constant index
            pl.BlockSpec((1, h1_dim), lambda i: (0, 0)),            #   -> VMEM-resident across
            pl.BlockSpec((h1_dim, h2_dim), lambda i: (0, 0)),       #      grid steps
            pl.BlockSpec((1, h2_dim), lambda i: (0, 0)),
            pl.BlockSpec((h2_dim, out_pad), lambda i: (0, 0)),
            pl.BlockSpec((1, out_pad), lambda i: (0, 0)),
        ],
        out_specs=pl.BlockSpec((tb, out_pad), lambda i: (i, 0)),
        compiler_params=pltpu.CompilerParams(
            dimension_semantics=("parallel",),
            vmem_limit_bytes=8 << 20,
        ),
    )(x, w1, b1, w2, b2, w3, b3)

    return out[:B, :out_dim]


def init_dqn_params(key, input_dim, output_dim):
    """Deterministic init mimicking torch.nn.Linear defaults: U(-1/sqrt(fan_in), 1/sqrt(fan_in))."""
    dims = [(input_dim, 128), (128, 64), (64, output_dim)]
    params = []
    for (fan_in, fan_out) in dims:
        key, kw, kb = jax.random.split(key, 3)
        bound = 1.0 / math.sqrt(fan_in)
        w = jax.random.uniform(kw, (fan_in, fan_out), jnp.float32, -bound, bound)
        b = jax.random.uniform(kb, (1, fan_out), jnp.float32, -bound, bound)
        params += [w, b]
    return tuple(params)


def dqn_reference(x_nchw, params):
    """Pure-JAX f32 reference for correctness checking."""
    w1, b1, w2, b2, w3, b3 = params
    x = x_nchw.reshape(x_nchw.shape[0], -1)
    h1 = jnp.maximum(x @ w1 + b1, 0.0)
    h2 = jnp.maximum(h1 @ w2 + b2, 0.0)
    return h2 @ w3 + b3


if __name__ == "__main__":
    key = jax.random.PRNGKey(0)
    k_x, k_p = jax.random.split(key)

    # Small shapes: batch=2, NCHW image (4, 16, 16) -> input_dim = 1024, 8 actions.
    B, C, H, W = 2, 4, 16, 16
    input_dim = C * H * W
    output_dim = 8

    x = jax.random.normal(k_x, (B, C, H, W), jnp.float32)
    params = init_dqn_params(k_p, input_dim, output_dim)

    prepped, out_dim = prepare_dqn_params(params)   # one-time: bf16 + lane-pad
    out = dqn_forward(x, prepped, out_dim)
    out = jax.block_until_ready(out)

    ref = dqn_reference(x, params)
    assert out.shape == (B, output_dim)
    # bf16 weight quantization introduces ~0.4% relative error vs the f32 module.
    assert jnp.allclose(out, ref, atol=2e-2, rtol=2e-2), "Pallas output mismatch vs reference"

    print("KERNEL_OK")
</pallas_src>

<mosaic_0001>
module attributes {stable_mosaic.version = 11 : i64} {
  func.func @dqn_kernel(%arg0: i32, %arg1: memref<8x1024xf32, #tpu.memory_space<vmem>>, %arg2: memref<1024x128xbf16, #tpu.memory_space<vmem>>, %arg3: memref<1x128xf32, #tpu.memory_space<vmem>>, %arg4: memref<128x64xbf16, #tpu.memory_space<vmem>>, %arg5: memref<1x64xf32, #tpu.memory_space<vmem>>, %arg6: memref<64x128xbf16, #tpu.memory_space<vmem>>, %arg7: memref<1x128xf32, #tpu.memory_space<vmem>>, %arg8: memref<8x128xf32, #tpu.memory_space<vmem>>) attributes {dimension_semantics = [#tpu.dimension_semantics<parallel>], iteration_bounds = array<i64: 1>, scalar_prefetch = 0 : i64, scratch_operands = 0 : i64, tpu.core_type = #tpu.core_type<tc>, window_params = [{transform_indices = @transform_0, window_bounds = array<i64: 8, 1024>}, {pipeline_mode = #tpu.pipeline_mode<synchronous>, transform_indices = @transform_1, window_bounds = array<i64: 1024, 128>}, {pipeline_mode = #tpu.pipeline_mode<synchronous>, transform_indices = @transform_2, window_bounds = array<i64: 1, 128>}, {pipeline_mode = #tpu.pipeline_mode<synchronous>, transform_indices = @transform_3, window_bounds = array<i64: 128, 64>}, {pipeline_mode = #tpu.pipeline_mode<synchronous>, transform_indices = @transform_4, window_bounds = array<i64: 1, 64>}, {pipeline_mode = #tpu.pipeline_mode<synchronous>, transform_indices = @transform_5, window_bounds = array<i64: 64, 128>}, {pipeline_mode = #tpu.pipeline_mode<synchronous>, transform_indices = @transform_6, window_bounds = array<i64: 1, 128>}, {transform_indices = @transform_7, window_bounds = array<i64: 8, 128>}]} {
    %c0 = arith.constant 0 : index
    %c0_0 = arith.constant 0 : index
    %0 = vector.load %arg1[%c0, %c0_0] : memref<8x1024xf32, #tpu.memory_space<vmem>>, vector<8x1024xf32>
    %c0_1 = arith.constant 0 : index
    %c0_2 = arith.constant 0 : index
    %1 = vector.load %arg2[%c0_1, %c0_2] : memref<1024x128xbf16, #tpu.memory_space<vmem>>, vector<1024x128xbf16>
    %2 = arith.extf %1 : vector<1024x128xbf16> to vector<1024x128xf32>
    %cst = arith.constant dense<0.000000e+00> : vector<8x128xf32>
    %3 = tpu.matmul %0, %2, %cst {dimension_numbers = #tpu.dot_dimension_numbers<[1], [0], [0], [1], [0, 0, 1, 1], [], []>} : vector<8x1024xf32>, vector<1024x128xf32>, vector<8x128xf32> -> vector<8x128xf32>
    %c0_3 = arith.constant 0 : index
    %c0_4 = arith.constant 0 : index
    %4 = vector.load %arg3[%c0_3, %c0_4] : memref<1x128xf32, #tpu.memory_space<vmem>>, vector<1x128xf32>
    %5 = vector.broadcast %4 : vector<1x128xf32> to vector<8x128xf32>
    %6 = arith.addf %3, %5 : vector<8x128xf32>
    %cst_5 = arith.constant 0.000000e+00 : f32
    %7 = vector.broadcast %cst_5 : f32 to vector<8x128xf32>
    %8 = arith.maximumf %6, %7 : vector<8x128xf32>
    %c0_6 = arith.constant 0 : index
    %c0_7 = arith.constant 0 : index
    %9 = vector.load %arg4[%c0_6, %c0_7] : memref<128x64xbf16, #tpu.memory_space<vmem>>, vector<128x64xbf16>
    %10 = arith.extf %9 : vector<128x64xbf16> to vector<128x64xf32>
    %cst_8 = arith.constant dense<0.000000e+00> : vector<8x64xf32>
    %11 = tpu.matmul %8, %10, %cst_8 {dimension_numbers = #tpu.dot_dimension_numbers<[1], [0], [0], [1], [0, 0, 1, 1], [], []>} : vector<8x128xf32>, vector<128x64xf32>, vector<8x64xf32> -> vector<8x64xf32>
    %c0_9 = arith.constant 0 : index
    %c0_10 = arith.constant 0 : index
    %12 = vector.load %arg5[%c0_9, %c0_10] : memref<1x64xf32, #tpu.memory_space<vmem>>, vector<1x64xf32>
    %13 = vector.broadcast %12 : vector<1x64xf32> to vector<8x64xf32>
    %14 = arith.addf %11, %13 : vector<8x64xf32>
    %cst_11 = arith.constant 0.000000e+00 : f32
    %15 = vector.broadcast %cst_11 : f32 to vector<8x64xf32>
    %16 = arith.maximumf %14, %15 : vector<8x64xf32>
    %c0_12 = arith.constant 0 : index
    %c0_13 = arith.constant 0 : index
    %17 = vector.load %arg6[%c0_12, %c0_13] : memref<64x128xbf16, #tpu.memory_space<vmem>>, vector<64x128xbf16>
    %18 = arith.extf %17 : vector<64x128xbf16> to vector<64x128xf32>
    %cst_14 = arith.constant dense<0.000000e+00> : vector<8x128xf32>
    %19 = tpu.matmul %16, %18, %cst_14 {dimension_numbers = #tpu.dot_dimension_numbers<[1], [0], [0], [1], [0, 0, 1, 1], [], []>} : vector<8x64xf32>, vector<64x128xf32>, vector<8x128xf32> -> vector<8x128xf32>
    %c0_15 = arith.constant 0 : index
    %c0_16 = arith.constant 0 : index
    %20 = vector.load %arg7[%c0_15, %c0_16] : memref<1x128xf32, #tpu.memory_space<vmem>>, vector<1x128xf32>
    %21 = vector.broadcast %20 : vector<1x128xf32> to vector<8x128xf32>
    %22 = arith.addf %19, %21 : vector<8x128xf32>
    %c0_17 = arith.constant 0 : index
    %c0_18 = arith.constant 0 : index
    %23 = vector.load %arg8[%c0_17, %c0_18] : memref<8x128xf32, #tpu.memory_space<vmem>>, vector<8x128xf32>
    tpu.vector_store %arg8[%c0_17, %c0_18], %22 {strides = array<i32>} : memref<8x128xf32, #tpu.memory_space<vmem>>, vector<8x128xf32>,
    return
  }
  func.func @transform_0(%arg0: i32) -> (i32, i32) {
    %c0_i32 = arith.constant 0 : i32
    %c0_i32_0 = arith.constant 0 : i32
    return %arg0, %c0_i32 : i32, i32
  }
  func.func @transform_1(%arg0: i32) -> (i32, i32) {
    %c0_i32 = arith.constant 0 : i32
    %c0_i32_0 = arith.constant 0 : i32
    %c0_i32_1 = arith.constant 0 : i32
    return %c0_i32, %c0_i32_0 : i32, i32
  }
  func.func @transform_2(%arg0: i32) -> (i32, i32) {
    %c0_i32 = arith.constant 0 : i32
    %c0_i32_0 = arith.constant 0 : i32
    %c0_i32_1 = arith.constant 0 : i32
    return %c0_i32, %c0_i32_0 : i32, i32
  }
  func.func @transform_3(%arg0: i32) -> (i32, i32) {
    %c0_i32 = arith.constant 0 : i32
    %c0_i32_0 = arith.constant 0 : i32
    %c0_i32_1 = arith.constant 0 : i32
    return %c0_i32, %c0_i32_0 : i32, i32
  }
  func.func @transform_4(%arg0: i32) -> (i32, i32) {
    %c0_i32 = arith.constant 0 : i32
    %c0_i32_0 = arith.constant 0 : i32
    %c0_i32_1 = arith.constant 0 : i32
    return %c0_i32, %c0_i32_0 : i32, i32
  }
  func.func @transform_5(%arg0: i32) -> (i32, i32) {
    %c0_i32 = arith.constant 0 : i32
    %c0_i32_0 = arith.constant 0 : i32
    %c0_i32_1 = arith.constant 0 : i32
    return %c0_i32, %c0_i32_0 : i32, i32
  }
  func.func @transform_6(%arg0: i32) -> (i32, i32) {
    %c0_i32 = arith.constant 0 : i32
    %c0_i32_0 = arith.constant 0 : i32
    %c0_i32_1 = arith.constant 0 : i32
    return %c0_i32, %c0_i32_0 : i32, i32
  }
  func.func @transform_7(%arg0: i32) -> (i32, i32) {
    %c0_i32 = arith.constant 0 : i32
    %c0_i32_0 = arith.constant 0 : i32
    return %arg0, %c0_i32 : i32, i32
  }
}

</mosaic_0001>

<bundles_post_ra>
// kernel: tpu_custom_call.1
= control target key start
LH: loop header
LB: loop body
LE: loop exit
PB: predicated region body
PF: predicated region fallthrough
CT: control target
= control target key end

     0   :  { %12 = vsyncpa [#allocation3], 0  ;;  %s1776_s0 = inlined_call_operand.vmem [shape: f32[8,1024], index: 0, kind: input, shape index: {}]   ;;  %s1777_s1 = inlined_call_operand.hbm [shape: bf16[1024,128], index: 1, kind: input, shape index: {}]   ;;  %s1778_s2 = inlined_call_operand.vmem [shape: f32[1,128], index: 2, kind: input, shape index: {}]   ;;  %s1779_s3 = inlined_call_operand.vmem [shape: bf16[128,64], index: 3, kind: input, shape index: {}]   ;;  %s1780_s4 = inlined_call_operand.vmem [shape: f32[1,64], index: 4, kind: input, shape index: {}]   ;;  %s1781_s5 = inlined_call_operand.vmem [shape: bf16[64,128], index: 5, kind: input, shape index: {}]   ;;  %s1782_s6 = inlined_call_operand.vmem [shape: f32[1,128], index: 6, kind: input, shape index: {}]   ;;  %s1783_s7 = inlined_call_operand.hbm [shape: f32[8,128], index: 7, kind: output, shape index: {}]  }
   0x1   :  { %13 = vsyncpa [#allocation4], 0  ;;  %s1636_s24 = smov [#allocation2]   ;;  %s1588_s28 = scalar_lea.hbm %s1777_s1, 8192 }
   0x2   :  { %s21_s25 = sshll.u32 %s1636_s24, 4  ;;  %p1589_p0 = scmp.ne.s32.totalorder %s1777_s1, %s1588_s28  ;;  %s22_s25 = int_to_ptr.vmem [resolvable:$true] %s21_s25 }
   0x3   :  { %p1592_p1 = scmp.lt.u32.totalorder %s1588_s28, %s1777_s1 }
   0x5   :  { %p1594_p2 = pnand %p1592_p1, %p1589_p0 }
   0x7   :  { %1597 = shalt.err (!%p1594_p2)
}
   0x8   :  { %s1598_s10 = scalar_lea.vmem %s22_s25, 8192  ;;  %p1603_p4 = scmp.lt.s32.totalorder %s22_s25, %s22_s25 }
   0x9   :  { %p1599_p3 = scmp.ne.s32.totalorder %s22_s25, %s1598_s10  ;;  %p1604_p5 = scmp.lt.s32.totalorder %s1598_s10, %s1598_s10 }
   0xb   :  { %p1605_p6 = por %p1604_p5, %p1603_p4 }
   0xd   :  { %p1606_p7 = pnand %p1605_p6, %p1599_p3 }
   0xf   :  { %1609 = shalt.err (!%p1606_p7)
}
  0x10   :  { %s1637_s11 = smov 64   ;;  %s1638_s12 = smov 4  }
  0x11   :  { %27 = dma.hbm_to_vmem [thread:$0]  %s1777_s1, 8192, %s22_s25, [#allocation3], %s1637_s11, %s1637_s11, %s1638_s12  }
  0x12   :  { %1632 = dma.done.wait [#allocation3], 8192  }
  0x13   :  { %1633 = vsyncadd [#allocation3], 4294959104  ;;  %v1131_v0 = vld [vmem:[#allocation2 + $0x40] sm:$0xff]   ;;  %v1132_v4 = vld [vmem:[#allocation2 + $0x48] sm:$0xff]   ;;  %vm1640_vm0 = vmmov 0   ;;  %vm726_vm1 = vcmask 523264  }
  0x14   :  { %v821_v1 = vld [vmem:[#allocation2] sm:$0xff]   ;;  %1418 = vmatprep.subr.bf16.mxu0 %v1131_v0  ;;  %v1148_v5 = vld [vmem:[#allocation2 + $0xc8] sm:$0xff]   ;;  %v1133_v8 = vld [vmem:[#allocation2 + $0x50] sm:$0xff]   ;;  %s1642_s10 = smov [#allocation5]  }
  0x15   :  { %v1147_v2 = vld [vmem:[#allocation2 + $0xc0] sm:$0xff]   ;;  %1420 = vmatpush3.bf16.msra.mxu0 %v821_v1  ;;  %v1124_v6 = vld [vmem:[#allocation2 + $0x8] sm:$0xff]   ;;  %v1149_v9 = vld [vmem:[#allocation2 + $0xd0] sm:$0xff]   ;;  %s807_s11 = sshll.u32 %s1642_s10, 4  ;;  %s808_s11 = int_to_ptr.vmem [resolvable:$true] %s807_s11 }
  0x16   :  { %1450 = vmatprep.subr.bf16.mxu1 %v1147_v2  ;;  %v1139_v3 = vld [vmem:[#allocation2 + $0x80] sm:$0xff]   ;;  %1422 = vmatprep.subr.bf16.mxu0 %v1132_v4  ;;  %v1140_v7 = vld [vmem:[#allocation2 + $0x88] sm:$0xff]   ;;  %v1125_v10 = vld [vmem:[#allocation2 + $0x10] sm:$0xff]   ;;  %p1615_p9 = scmp.lt.s32.totalorder %s808_s11, %s808_s11 }
  0x17   :  { %1452 = vmatpush3.bf16.msra.mxu1 %v1139_v3  ;;  %v1141_v11 = vld [vmem:[#allocation2 + $0x90] sm:$0xff]   ;;  %v1134_v12 = vld [vmem:[#allocation2 + $0x58] sm:$0xff]   ;;  %v42_v14 = vld [vmem:[%s1776_s0 + $0x8] sm:$0xff] }
  0x18   :  { %1454 = vmatprep.subr.bf16.mxu1 %v1148_v5  ;;  %v1150_v13 = vld [vmem:[#allocation2 + $0xd8] sm:$0xff]   ;;  %v1135_v18 = vld [vmem:[#allocation2 + $0x60] sm:$0xff]   ;;  %376 = vmatprep.mubr.f32.mxu0 %v42_v14  ;;  %v1136_v22 = vld [vmem:[#allocation2 + $0x68] sm:$0xff]  }
  0x19   :  { %1424 = vmatpush3.bf16.msra.mxu0 %v1124_v6  ;;  %v1126_v15 = vld [vmem:[#allocation2 + $0x18] sm:$0xff]   ;;  %v1151_v19 = vld [vmem:[#allocation2 + $0xe0] sm:$0xff]   ;;  %v1152_v23 = vld [vmem:[#allocation2 + $0xe8] sm:$0xff]  }
  0x1a   :  { %1426 = vmatprep.subr.bf16.mxu0 %v1133_v8  ;;  %v1142_v16 = vld [vmem:[#allocation2 + $0x98] sm:$0xff]   ;;  %v1127_v20 = vld [vmem:[#allocation2 + $0x20] sm:$0xff]   ;;  %v1128_v24 = vld [vmem:[#allocation2 + $0x28] sm:$0xff]  }
  0x1b   :  { %1456 = vmatpush3.bf16.msra.mxu1 %v1140_v7  ;;  %v44_v17 = vld [vmem:[%s1776_s0 + $0x18] sm:$0xff]  ;;  %v1143_v21 = vld [vmem:[#allocation2 + $0xa0] sm:$0xff]   ;;  %v1144_v25 = vld [vmem:[#allocation2 + $0xa8] sm:$0xff]  }
  0x1c   :  { %1458 = vmatprep.subr.bf16.mxu1 %v1149_v9  ;;  %446 = vmatprep.mubr.f32.mxu1 %v44_v17  ;;  %v1137_v26 = vld [vmem:[#allocation2 + $0x70] sm:$0xff]   ;;  %v1138_v30 = vld [vmem:[#allocation2 + $0x78] sm:$0xff]   ;;  %v1163_v34 = vld [vmem:[#allocation2 + $0x140] sm:$0xff]   ;;  %v1639_v9 = vmov 0.0|0.0   ;;  %v1641_v17 = vmov 0.0  }
  0x1d   :  { %1428 = vmatpush3.bf16.msra.mxu0 %v1125_v10  ;;  %v1153_v27 = vld [vmem:[#allocation2 + $0xf0] sm:$0xff]   ;;  %v1154_v31 = vld [vmem:[#allocation2 + $0xf8] sm:$0xff]   ;;  %v1179_v35 = vld [vmem:[#allocation2 + $0x1c0] sm:$0xff]  }
  0x1e   :  { %1430 = vmatprep.subr.bf16.mxu0 %v1134_v12  ;;  %v1129_v28 = vld [vmem:[#allocation2 + $0x30] sm:$0xff]   ;;  %v1130_v32 = vld [vmem:[#allocation2 + $0x38] sm:$0xff]   ;;  %v41_v36 = vld [vmem:[%s1776_s0] sm:$0xff] }
  0x1f   :  { %1460 = vmatpush3.bf16.msra.mxu1 %v1141_v11  ;;  %v1145_v29 = vld [vmem:[#allocation2 + $0xb0] sm:$0xff]   ;;  %v1146_v33 = vld [vmem:[#allocation2 + $0xb8] sm:$0xff]   ;;  %v1155_v38 = vld [vmem:[#allocation2 + $0x100] sm:$0xff]  }
  0x20   :  { %1462 = vmatprep.subr.bf16.mxu1 %v1150_v13  ;;  %v43_v37 = vld [vmem:[%s1776_s0 + $0x10] sm:$0xff]  ;;  %v1171_v39 = vld [vmem:[#allocation2 + $0x180] sm:$0xff]   ;;  %v1164_v40 = vld [vmem:[#allocation2 + $0x148] sm:$0xff]  }
  0x21   :  { %1432 = vmatpush3.bf16.msra.mxu0 %v1126_v15  ;;  %v1180_v41 = vld [vmem:[#allocation2 + $0x1c8] sm:$0xff]   ;;  %v48_v43 = vld [vmem:[%s1776_s0 + $0x38] sm:$0xff]  ;;  %v1165_v46 = vld [vmem:[#allocation2 + $0x150] sm:$0xff]  }
  0x22   :  { %1434 = vmatprep.subr.bf16.mxu0 %v1135_v18  ;;  %v46_v42 = vld [vmem:[%s1776_s0 + $0x28] sm:$0xff]  ;;  %v1181_v47 = vld [vmem:[#allocation2 + $0x1d0] sm:$0xff]   ;;  %v1166_v50 = vld [vmem:[#allocation2 + $0x158] sm:$0xff]  }
  0x23   :  { %1464 = vmatpush3.bf16.msra.mxu1 %v1142_v16  ;;  %v1156_v44 = vld [vmem:[#allocation2 + $0x108] sm:$0xff]   ;;  %v1157_v48 = vld [vmem:[#allocation2 + $0x110] sm:$0xff]   ;;  %v1182_v51 = vld [vmem:[#allocation2 + $0x1d8] sm:$0xff]  }
  0x24   :  { %1466 = vmatprep.subr.bf16.mxu1 %v1151_v19  ;;  %v1172_v45 = vld [vmem:[#allocation2 + $0x188] sm:$0xff]   ;;  %v1173_v49 = vld [vmem:[#allocation2 + $0x190] sm:$0xff]   ;;  %v1158_v52 = vld [vmem:[#allocation2 + $0x118] sm:$0xff]  }
  0x25   :  { %1436 = vmatpush3.bf16.msra.mxu0 %v1127_v20  ;;  %v1174_v53 = vld [vmem:[#allocation2 + $0x198] sm:$0xff]   ;;  %v1167_v54 = vld [vmem:[#allocation2 + $0x160] sm:$0xff]   ;;  %v1168_v58 = vld [vmem:[#allocation2 + $0x168] sm:$0xff]  }
  0x26   :  { %1438 = vmatprep.subr.bf16.mxu0 %v1136_v22  ;;  %v1183_v55 = vld [vmem:[#allocation2 + $0x1e0] sm:$0xff]   ;;  %v1184_v59 = vld [vmem:[#allocation2 + $0x1e8] sm:$0xff]   ;;  %v1169_v62 = vld [vmem:[#allocation2 + $0x170] sm:$0xff]  }
  0x27   :  { %1468 = vmatpush3.bf16.msra.mxu1 %v1143_v21  ;;  %v1159_v56 = vld [vmem:[#allocation2 + $0x120] sm:$0xff]   ;;  %v1160_v60 = vld [vmem:[#allocation2 + $0x128] sm:$0xff]   ;;  %v1185_v63 = vld [vmem:[#allocation2 + $0x1f0] sm:$0xff]  }
  0x28   :  { %1470 = vmatprep.subr.bf16.mxu1 %v1152_v23  ;;  %v1175_v57 = vld [vmem:[#allocation2 + $0x1a0] sm:$0xff]   ;;  %v1176_v61 = vld [vmem:[#allocation2 + $0x1a8] sm:$0xff]   ;;  %v1161_v0 = vld [vmem:[#allocation2 + $0x130] sm:$0xff]  }
  0x29   :  { %1440 = vmatpush3.bf16.msra.mxu0 %v1128_v24  ;;  %v1177_v1 = vld [vmem:[#allocation2 + $0x1b0] sm:$0xff]   ;;  %v1170_v2 = vld [vmem:[#allocation2 + $0x178] sm:$0xff]   ;;  %v45_v6 = vld [vmem:[%s1776_s0 + $0x20] sm:$0xff] }
  0x2a   :  { %1442 = vmatprep.subr.bf16.mxu0 %v1137_v26  ;;  %v1186_v3 = vld [vmem:[#allocation2 + $0x1f8] sm:$0xff]   ;;  %v47_v7 = vld [vmem:[%s1776_s0 + $0x30] sm:$0xff]  ;;  %v1077_v8 = vld [vmem:[%s1779_s3] sm:$0xff]  }
  0x2b   :  { %1472 = vmatpush3.bf16.msra.mxu1 %v1144_v25  ;;  %v1162_v4 = vld [vmem:[#allocation2 + $0x138] sm:$0xff]   ;;  %v1187_v10 = vld [vmem:[%s1779_s3 + $0x8] sm:$0xff]   ;;  %v1188_v11 = vld [vmem:[%s1779_s3 + $0x10] sm:$0xff]  }
  0x2c   :  { %1474 = vmatprep.subr.bf16.mxu1 %v1153_v27  ;;  %v1178_v5 = vld [vmem:[#allocation2 + $0x1b8] sm:$0xff]   ;;  %v1190_v13 = vld [vmem:[%s1779_s3 + $0x20] sm:$0xff]   ;;  %v1191_v14 = vld [vmem:[%s1779_s3 + $0x28] sm:$0xff]  }
  0x2d   :  { %1444 = vmatpush3.bf16.msra.mxu0 %v1129_v28  ;;  %v1189_v12 = vld [vmem:[%s1779_s3 + $0x18] sm:$0xff]   ;;  %v1192_v15 = vld [vmem:[%s1779_s3 + $0x30] sm:$0xff]   ;;  %v1109_v18 = vld [vmem:[%s1781_s5] sm:$0xff]  }
  0x2e   :  { %1446 = vmatprep.subr.bf16.mxu0 %v1138_v30  ;;  %v1193_v16 = vld [vmem:[%s1779_s3 + $0x38] sm:$0xff]   ;;  %v1194_v19 = vld [vmem:[%s1781_s5 + $0x8] sm:$0xff]   ;;  %v1195_v20 = vld [vmem:[%s1781_s5 + $0x10] sm:$0xff]  }
  0x2f   :  { %1476 = vmatpush3.bf16.msra.mxu1 %v1145_v29  ;;  %v816_v23 = vld [vmem:[%s1778_s2] ss:$0 sm:$0xff] }
  0x30   :  { %1478 = vmatprep.subr.bf16.mxu1 %v1154_v31 }
  0x31   :  { %1448 = vmatpush3.bf16.msra.mxu0 %v1130_v32 }
  0x32   :  { %1482 = vmatprep.subr.bf16.mxu0 %v1163_v34 }
  0x33   :  { %1480 = vmatpush3.bf16.msra.mxu1 %v1146_v33 }
  0x34   :  { %1514 = vmatprep.subr.bf16.mxu1 %v1179_v35  ;;  %377 = vmatmul.mubr.f32.vlgmr.msra.gmra.mrb[0].mxu0 %v41_v36 }
  0x35   :  { %1484 = vmatpush3.bf16.msra.mxu0 %v1155_v38  ;;  %516 = vmatprep.mubr.f32.mxu0 %v46_v42 }
  0x36   :  { %447 = vmatmul.mubr.f32.vlgmr.msra.gmra.mrb[0].mxu1 %v43_v37  ;;  %1486 = vmatprep.subr.bf16.mxu0 %v1164_v40  ;;  %v817_v40 = vld [vmem:[%s1780_s4] ss:$0 sm:$0xff] }
  0x37   :  { %1516 = vmatpush3.bf16.msra.mxu1 %v1171_v39  ;;  %586 = vmatprep.mubr.f32.mxu1 %v48_v43  ;;  %v1196_v39 = vld [vmem:[%s1781_s5 + $0x18] sm:$0xff]   ;;  %s1610_s5 = scalar_lea.vmem %s808_s11, 128 }
  0x38   :  { %1518 = vmatprep.subr.bf16.mxu1 %v1180_v41  ;;  %p1611_p8 = scmp.ne.s32.totalorder %s808_s11, %s1610_s5  ;;  %p1616_p10 = scmp.lt.s32.totalorder %s1610_s5, %s1610_s5 }
  0x39   :  { %1488 = vmatpush3.bf16.msra.mxu0 %v1156_v44 }
  0x3a   :  { %1490 = vmatprep.subr.bf16.mxu0 %v1165_v46  ;;  %p1617_p11 = por %p1616_p10, %p1615_p9 }
  0x3b   :  { %1520 = vmatpush3.bf16.msra.mxu1 %v1172_v45  ;;  %v818_v45 = vld [vmem:[%s1782_s6] ss:$0 sm:$0xff] }
  0x3c   :  { %1522 = vmatprep.subr.bf16.mxu1 %v1181_v47  ;;  %p1618_p12 = pnand %p1617_p11, %p1611_p8 }
  0x3d   :  { %1492 = vmatpush3.bf16.msra.mxu0 %v1157_v48 }
  0x3e   :  { %1494 = vmatprep.subr.bf16.mxu0 %v1166_v50 }
  0x3f   :  { %1524 = vmatpush3.bf16.msra.mxu1 %v1173_v49 }
  0x40   :  { %1526 = vmatprep.subr.bf16.mxu1 %v1182_v51 }
  0x41   :  { %1496 = vmatpush3.bf16.msra.mxu0 %v1158_v52 }
  0x42   :  { %1498 = vmatprep.subr.bf16.mxu0 %v1167_v54 }
  0x43   :  { %1528 = vmatpush3.bf16.msra.mxu1 %v1174_v53 }
  0x44   :  { %1530 = vmatprep.subr.bf16.mxu1 %v1183_v55 }
  0x45   :  { %1500 = vmatpush3.bf16.msra.mxu0 %v1159_v56 }
  0x46   :  { %1502 = vmatprep.subr.bf16.mxu0 %v1168_v58 }
  0x47   :  { %1532 = vmatpush3.bf16.msra.mxu1 %v1175_v57 }
  0x48   :  { %1534 = vmatprep.subr.bf16.mxu1 %v1184_v59 }
  0x49   :  { %1504 = vmatpush3.bf16.msra.mxu0 %v1160_v60 }
  0x4a   :  { %1506 = vmatprep.subr.bf16.mxu0 %v1169_v62 }
  0x4b   :  { %1536 = vmatpush3.bf16.msra.mxu1 %v1176_v61 }
  0x4c   :  { %1538 = vmatprep.subr.bf16.mxu1 %v1185_v63 }
  0x4d   :  { %1508 = vmatpush3.bf16.msra.mxu0 %v1161_v0 }
  0x4e   :  { %1510 = vmatprep.subr.bf16.mxu0 %v1170_v2 }
  0x4f   :  { %1540 = vmatpush3.bf16.msra.mxu1 %v1177_v1 }
  0x50   :  { %1542 = vmatprep.subr.bf16.mxu1 %v1186_v3 }
  0x51   :  { %1512 = vmatpush3.bf16.msra.mxu0 %v1162_v4 }
  0x52   :  { %1545 = vmatprep.subr.bf16.mxu0 %v1639_v9 }
  0x53   :  { %1544 = vmatpush3.bf16.msra.mxu1 %v1178_v5 }
  0x54   :  { %517 = vmatmul.mubr.f32.vlgmr.msra.gmra.mrb[2].mxu0 %v45_v6  ;;  %1569 = vmatprep.subr.bf16.mxu1 %v1639_v9 }
  0x55   :  { %1547 = vmatpush3.bf16.msra.mxu0 %v1077_v8  ;;  %1395 = vmatprep.mubr.msk.f32.mxu0 %vm1640_vm0, %v1641_v17 }
  0x56   :  { %587 = vmatmul.mubr.f32.vlgmr.msra.gmra.mrb[2].mxu1 %v47_v7  ;;  %1548 = vmatprep.subr.bf16.mxu0 %v1639_v9 }
  0x57   :  { %1414 = vmatprep.mubr.msk.f32.mxu1 %vm1640_vm0, %v1641_v17  ;;  %1571 = vmatpush3.bf16.msra.mxu1 %v1109_v18 }
  0x58   :  { %1572 = vmatprep.subr.bf16.mxu1 %v1639_v9 }
  0x59   :  { %1550 = vmatpush3.bf16.msra.mxu0 %v1187_v10 }
  0x5a   :  { %1551 = vmatprep.subr.bf16.mxu0 %v1639_v9 }
  0x5b   :  { %1574 = vmatpush3.bf16.msra.mxu1 %v1194_v19 }
  0x5c   :  { %1575 = vmatprep.subr.bf16.mxu1 %v1639_v9 }
  0x5d   :  { %1553 = vmatpush3.bf16.msra.mxu0 %v1188_v11 }
  0x5e   :  { %1554 = vmatprep.subr.bf16.mxu0 %v1639_v9 }
  0x5f   :  { %1577 = vmatpush3.bf16.msra.mxu1 %v1195_v20 }
  0x60   :  { %1578 = vmatprep.subr.bf16.mxu1 %v1639_v9 }
  0x61   :  { %1556 = vmatpush3.bf16.msra.mxu0 %v1189_v12 }
  0x62   :  { %1557 = vmatprep.subr.bf16.mxu0 %v1639_v9 }
  0x63   :  { %1580 = vmatpush3.bf16.msra.mxu1 %v1196_v39 }
  0x65   :  { %1559 = vmatpush3.bf16.msra.mxu0 %v1190_v13 }
  0x66   :  { %1560 = vmatprep.subr.bf16.mxu0 %v1639_v9 }
  0x69   :  { %1562 = vmatpush3.bf16.msra.mxu0 %v1191_v14 }
  0x6a   :  { %1563 = vmatprep.subr.bf16.mxu0 %v1639_v9 }
  0x6d   :  { %1565 = vmatpush3.bf16.msra.mxu0 %v1192_v15 }
  0x6e   :  { %1566 = vmatprep.subr.bf16.mxu0 %v1639_v9 }
  0x71   :  { %1568 = vmatpush3.bf16.msra.mxu0 %v1193_v16 }
 0x107   :  { %v1229_v21 = vpop.f32.mrb[0].mxu0 }
 0x108   :  { %v1230_v24 = vpop.f32.mrb[1].mxu0 }
 0x109   :  { %v1264_v22 = vpop.f32.mrb[0].mxu1  ;;  %v1231_v26 = vadd.f32 %v1230_v24, %v1229_v21 }
 0x10a   :  { %v1265_v25 = vpop.f32.mrb[1].mxu1 }
 0x10b   :  { %v1266_v27 = vadd.f32 %v1265_v25, %v1264_v22  ;;  %v379_v28 = vadd.f32 %v1231_v26, %v816_v23 }
 0x10d   :  { %v449_v29 = vadd.f32 %v1266_v27, %v379_v28 }
 0x127   :  { %v1299_v30 = vpop.f32.mrb[2].mxu0 }
 0x128   :  { %v1300_v32 = vpop.f32.mrb[3].mxu0 }
 0x129   :  { %v1334_v31 = vpop.f32.mrb[2].mxu1  ;;  %v1301_v34 = vadd.f32 %v1300_v32, %v1299_v30 }
 0x12a   :  { %v1335_v33 = vpop.f32.mrb[3].mxu1 }
 0x12b   :  { %v1336_v35 = vadd.f32 %v1335_v33, %v1334_v31  ;;  %v519_v36 = vadd.f32 %v1301_v34, %v449_v29 }
 0x12d   :  { %v589_v37 = vadd.f32 %v1336_v35, %v519_v36 }
 0x12f   :  { %v592_v38 = vmax.f32 %v589_v37, 0.0 }
 0x131   :  { %1396 = vmatmul.mubr.f32.vlgmr.msra.gmra.mrb[4].mxu0 %v592_v38 }
 0x204   :  { %v698_v41 = vpop.f32.mrb[4].mxu0 }
 0x205   :  { %v699_v42 = vadd.f32 %v817_v40, %v698_v41  ;;  %v1397_v43 = vpop.f32.mrb[5].mxu0 }
 0x207   :  { %v702_v44 = vmax.f32 %v699_v42, 0.0 }
 0x209   :  { %1415 = vmatmul.mubr.msk.f32.vlgmr.msra.gmra.mrb[4].mxu1 %vm726_vm1, %v702_v44 }
 0x2dc   :  { %v796_v46 = vpop.f32.mrb[4].mxu1 }
 0x2dd   :  { %v797_v47 = vadd.f32 %v818_v45, %v796_v46  ;;  %v1416_v48 = vpop.f32.mrb[5].mxu1 }
 0x2df   :  { %800 = vst [vmem:[#allocation5] sm:$0xff] %v797_v47 }
 0x2e0   :  { %1621 = shalt.err (!%p1618_p12)
}
 0x2e1   :  { %s1622_s0 = scalar_lea.hbm %s1783_s7, 128 }
 0x2e2   :  { %p1623_p13 = scmp.ne.s32.totalorder %s1783_s7, %s1622_s0  ;;  %p1626_p0 = scmp.lt.u32.totalorder %s1622_s0, %s1783_s7 }
 0x2e4   :  { %p1628_p1 = pnand %p1626_p0, %p1623_p13 }
 0x2e6   :  { %1631 = shalt.err (!%p1628_p1)
}
 0x2e7   :  { %810 = dma.vmem_to_hbm [thread:$0]  %s808_s11, 128, %s1783_s7, [#allocation4]  }
 0x2e8   :  { %1634 = dma.done.wait [#allocation4], 128  }
 0x2e9   :  { %1635 = vsyncadd [#allocation4], 4294967168 }
 0x2ea   :  { %814 = vsyncpa [#allocation3], 1 }
 0x2eb   :  { %815 = vsyncpa [#allocation4], 1 }

</bundles_post_ra>
